<compile_context>
chip_gen: v7x
topology: tpu7x:2x2x1
jax: 0.10.0
libtpu: 0.0.40
codegen_flags: <defaults>
</compile_context>

<pallas_src>
import jax
import jax.numpy as jnp
from jax.experimental import pallas as pl
from jax.experimental.pallas import tpu as pltpu  # noqa: F401  (TPU backend)

FEAT_DIM = 1
OUT_DIM = 2
HIDDEN_DIM = 100
BATCH = 32       # matches the fixed (32, 2) zero outputs of the reference module
LANES = 128

# Static packing assumptions (single 8x128 slab + spare lane for the folded bias).
assert OUT_DIM == 2, "2-class softmax specialization requires out_dim == 2"
assert HIDDEN_DIM < LANES, "need hidden_dim < 128 (one spare lane folds the output bias)"


def _mlp_softmax2_kernel(x_ref, z_ref, small_ref, o_ref):
    # x_ref, z_ref: (B, 1). FEAT_DIM == 1, so the first layer is a rank-1
    # broadcast outer product on the VPU (no MXU involved at all).
    xz = x_ref[...] + z_ref[...]                          # (B, 1)

    # small_ref: (8, 128) lane-dense packed params (full-width rows, no masking):
    #   row 0: y2_in weight row            (lanes >= H are 0)
    #   row 1: y2_in bias                  (lane H == 1.0 -> carries folded b2_diff)
    #   row 2: w2_diff = w2[:,1] - w2[:,0] (lane H == b2_diff, lanes > H are 0)
    w1 = small_ref[0:1, :]                                # (1, 128)
    b1 = small_ref[1:2, :]                                # (1, 128)
    w2d = small_ref[2:3, :]                               # (1, 128)

    # Hidden layer at full lane width; padding lanes stay exactly 0 through relu.
    h = jnp.maximum(xz * w1 + b1, 0.0)                    # (B, 128)

    # 2-class softmax only needs the logit difference:
    #   d = (h @ w2[:,1] + b2[1]) - (h @ w2[:,0] + b2[0])
    #     = sum(h * w2_diff) + b2_diff          (b2_diff rides in lane H where h == 1)
    d = jnp.sum(h * w2d, axis=-1, keepdims=True)          # (B, 1)  XLU lane reduce

    # softmax over 2 classes == sigmoid(d); tanh form is exact and overflow-free.
    p1 = 0.5 * (jnp.tanh(0.5 * d) + 1.0)                  # (B, 1)
    p0 = 1.0 - p1
    o_ref[...] = jnp.concatenate([p0, p1], axis=1)        # single (B, 2) store


def mlp_softmax2(x, z, small_packed):
    B = x.shape[0]
    full = lambda shape: pl.BlockSpec(shape, lambda: (0,) * len(shape))
    return pl.pallas_call(
        _mlp_softmax2_kernel,
        out_shape=jax.ShapeDtypeStruct((B, OUT_DIM), jnp.float32),
        in_specs=[full(x.shape), full(z.shape), full(small_packed.shape)],
        out_specs=full((B, OUT_DIM)),
    )(x, z, small_packed)


def linear_forward(x, z, params):
    """Reproduces linear.forward(x, z): (zeros((32,2)), y2, zeros((32,2)))."""
    y2 = mlp_softmax2(x, z, params["small_packed"])
    # Zero outputs are fixed (32, 2) in the reference regardless of batch.
    zeros = jnp.zeros((32, 2), dtype=jnp.float32)
    return zeros, y2, zeros


def _pack_small_params(w_in, b_in, w_out, b_out):
    """Pack y2_in (w,b) and the y2_out logit-difference into one (8,128) slab.

    w_in: (1, H)   b_in: (1, H)   w_out: (H, 2)   b_out: (1, 2)
    """
    w2_diff = w_out[:, 1] - w_out[:, 0]                   # (H,)
    b2_diff = b_out[0, 1] - b_out[0, 0]                   # scalar
    small = jnp.zeros((8, LANES), dtype=jnp.float32)
    small = small.at[0, :HIDDEN_DIM].set(w_in.reshape(-1))
    small = small.at[1, :HIDDEN_DIM].set(b_in.reshape(-1))
    small = small.at[2, :HIDDEN_DIM].set(w2_diff)
    # Bias-folding trick: lane HIDDEN_DIM carries a constant 1 through relu, so the
    # lane reduction picks up 1 * b2_diff with zero extra kernel ops.
    small = small.at[1, HIDDEN_DIM].set(1.0)
    small = small.at[2, HIDDEN_DIM].set(b2_diff)
    return small


def init_params(key):
    """Deterministic init mimicking torch.nn.Linear (U(-1/sqrt(fan_in), 1/sqrt(fan_in)))."""
    ks = jax.random.split(key, 2)

    def lin(k, fan_in, fan_out):
        kw, kb = jax.random.split(k)
        bound = 1.0 / jnp.sqrt(float(fan_in))
        w = jax.random.uniform(kw, (fan_in, fan_out), jnp.float32, -bound, bound)
        b = jax.random.uniform(kb, (1, fan_out), jnp.float32, -bound, bound)
        return w, b

    y2_in_w, y2_in_b = lin(ks[0], FEAT_DIM, HIDDEN_DIM)
    y2_out_w, y2_out_b = lin(ks[1], HIDDEN_DIM, OUT_DIM)
    return {
        "y2_in_w": y2_in_w,
        "y2_in_b": y2_in_b,
        "y2_out_w": y2_out_w,
        "y2_out_b": y2_out_b,
        # Packed once at init time; reused every forward call.
        "small_packed": _pack_small_params(y2_in_w, y2_in_b, y2_out_w, y2_out_b),
    }


def _reference_y2(x, z, params):
    """Pure-JAX reference for the y2 path (matches the torch module)."""
    xz = x + z
    h = jnp.maximum(xz @ params["y2_in_w"] + params["y2_in_b"], 0.0)
    logits = h @ params["y2_out_w"] + params["y2_out_b"]
    return jax.nn.softmax(logits, axis=-1)


if __name__ == "__main__":
    key = jax.random.PRNGKey(0)
    kp, kx, kz = jax.random.split(key, 3)

    params = init_params(kp)
    x = jax.random.normal(kx, (BATCH, FEAT_DIM), jnp.float32)
    z = jax.random.normal(kz, (BATCH, FEAT_DIM), jnp.float32)

    out0, y2, out2 = linear_forward(x, z, params)
    jax.block_until_ready((out0, y2, out2))

    # sanity: shapes, softmax rows sum to 1, zero outputs are zero
    assert out0.shape == (32, 2) and out2.shape == (32, 2)
    assert y2.shape == (BATCH, OUT_DIM)
    assert jnp.allclose(jnp.sum(y2, axis=-1), 1.0, atol=1e-5)
    assert float(jnp.abs(out0).sum()) == 0.0 and float(jnp.abs(out2).sum()) == 0.0

    # numerical check against pure-JAX reference (exact sigmoid-via-tanh epilogue)
    y2_ref = _reference_y2(x, z, params)
    assert jnp.allclose(y2, y2_ref, atol=1e-4, rtol=1e-4)

    # TODO(synk): the y1 and s branches of the torch module are computed but never
    # returned (dead code); they are intentionally not implemented.
    print("KERNEL_OK")
</pallas_src>

<mosaic_0001>
module attributes {stable_mosaic.version = 11 : i64} {
  func.func @_mlp_softmax2_kernel(%arg0: memref<32x1xf32, #tpu.memory_space<vmem>>, %arg1: memref<32x1xf32, #tpu.memory_space<vmem>>, %arg2: memref<8x128xf32, #tpu.memory_space<vmem>>, %arg3: memref<32x2xf32, #tpu.memory_space<vmem>>) attributes {dimension_semantics = [], scalar_prefetch = 0 : i64, scratch_operands = 0 : i64, tpu.core_type = #tpu.core_type<tc>} {
    %c0 = arith.constant 0 : index
    %c0_0 = arith.constant 0 : index
    %0 = vector.load %arg0[%c0, %c0_0] : memref<32x1xf32, #tpu.memory_space<vmem>>, vector<32x1xf32>
    %c0_1 = arith.constant 0 : index
    %c0_2 = arith.constant 0 : index
    %1 = vector.load %arg1[%c0_1, %c0_2] : memref<32x1xf32, #tpu.memory_space<vmem>>, vector<32x1xf32>
    %2 = arith.addf %0, %1 : vector<32x1xf32>
    %c0_3 = arith.constant 0 : index
    %c0_4 = arith.constant 0 : index
    %3 = vector.load %arg2[%c0_3, %c0_4] : memref<8x128xf32, #tpu.memory_space<vmem>>, vector<1x128xf32>
    %c1 = arith.constant 1 : index
    %c0_5 = arith.constant 0 : index
    %4 = vector.load %arg2[%c1, %c0_5] : memref<8x128xf32, #tpu.memory_space<vmem>>, vector<1x128xf32>
    %c2 = arith.constant 2 : index
    %c0_6 = arith.constant 0 : index
    %5 = vector.load %arg2[%c2, %c0_6] : memref<8x128xf32, #tpu.memory_space<vmem>>, vector<1x128xf32>
    %6 = vector.broadcast %2 : vector<32x1xf32> to vector<32x128xf32>
    %7 = vector.broadcast %3 : vector<1x128xf32> to vector<32x128xf32>
    %8 = arith.mulf %6, %7 : vector<32x128xf32>
    %9 = vector.broadcast %4 : vector<1x128xf32> to vector<32x128xf32>
    %10 = arith.addf %8, %9 : vector<32x128xf32>
    %cst = arith.constant 0.000000e+00 : f32
    %11 = vector.broadcast %cst : f32 to vector<32x128xf32>
    %12 = arith.maximumf %10, %11 : vector<32x128xf32>
    %13 = vector.broadcast %5 : vector<1x128xf32> to vector<32x128xf32>
    %14 = arith.mulf %12, %13 : vector<32x128xf32>
    %cst_7 = arith.constant dense<0.000000e+00> : vector<32xf32>
    %15 = vector.multi_reduction <add>, %14, %cst_7 [1] : vector<32x128xf32> to vector<32xf32>
    %16 = vector.shape_cast %15 : vector<32xf32> to vector<32x1xf32>
    %cst_8 = arith.constant 5.000000e-01 : f32
    %17 = vector.broadcast %cst_8 : f32 to vector<32x1xf32>
    %18 = arith.mulf %17, %16 : vector<32x1xf32>
    %19 = math.tanh %18 : vector<32x1xf32>
    %cst_9 = arith.constant 1.000000e+00 : f32
    %20 = vector.broadcast %cst_9 : f32 to vector<32x1xf32>
    %21 = arith.addf %19, %20 : vector<32x1xf32>
    %cst_10 = arith.constant 5.000000e-01 : f32
    %22 = vector.broadcast %cst_10 : f32 to vector<32x1xf32>
    %23 = arith.mulf %22, %21 : vector<32x1xf32>
    %cst_11 = arith.constant 1.000000e+00 : f32
    %24 = vector.broadcast %cst_11 : f32 to vector<32x1xf32>
    %25 = arith.subf %24, %23 : vector<32x1xf32>
    %26 = tpu.concatenate %25, %23 in 1 : vector<32x1xf32>, vector<32x1xf32> -> vector<32x2xf32>
    %c0_12 = arith.constant 0 : index
    %c0_13 = arith.constant 0 : index
    %27 = vector.load %arg3[%c0_12, %c0_13] : memref<32x2xf32, #tpu.memory_space<vmem>>, vector<32x2xf32>
    tpu.vector_store %arg3[%c0_12, %c0_13], %26 {strides = array<i32>} : memref<32x2xf32, #tpu.memory_space<vmem>>, vector<32x2xf32>,
    return
  }
}

</mosaic_0001>

<bundles_post_ra>
// kernel: tpu_custom_call.1
= control target key start
LH: loop header
LB: loop body
LE: loop exit
PB: predicated region body
PF: predicated region fallthrough
CT: control target
= control target key end

     0   :  { %v133_v0 = vmov 0   ;;  %vm105_vm0 = vcmask 7168   ;;  %vm110_vm1 = vcmask 15360   ;;  %s207_s0 = inlined_call_operand.vmem [shape: f32[32,1], index: 0, kind: input, shape index: {}]   ;;  %s208_s1 = inlined_call_operand.vmem [shape: f32[32,1], index: 1, kind: input, shape index: {}]   ;;  %s209_s2 = inlined_call_operand.vmem [shape: f32[8,128], index: 2, kind: input, shape index: {}]   ;;  %s210_s3 = inlined_call_operand.vmem [shape: f32[32,2], index: 3, kind: output, shape index: {}]  }
   0x1   :  { %124 = vset.pattern.permute.xlu1 %v133_v0  ;;  %123 = vset.pattern.permute.xlu0 %v133_v0  ;;  %v16_v1 = vld [vmem:[%s207_s0 + $0x10] sm:$0xff]  ;;  %v14_v3 = vld [vmem:[%s207_s0] sm:$0xff]  ;;  %v17_v6 = vld [vmem:[%s207_s0 + $0x18] sm:$0xff] }
   0x2   :  { %v20_v2 = vld [vmem:[%s208_s1 + $0x10] sm:$0xff]  ;;  %v18_v5 = vld [vmem:[%s208_s1] sm:$0xff]  ;;  %v21_v7 = vld [vmem:[%s208_s1 + $0x18] sm:$0xff] }
   0x3   :  { %v24_v4 = vadd.f32 %v20_v2, %v16_v1  ;;  %v22_v8 = vadd.f32 %v18_v5, %v14_v3  ;;  %v15_v9 = vld [vmem:[%s207_s0 + $0x8] sm:$0xff]  ;;  %v25_v11 = vadd.f32 %v21_v7, %v17_v6  ;;  %v119_v13 = vld [vmem:[%s209_s2] ss:$0 sm:$0xff]  ;;  %v120_v15 = vld [vmem:[%s209_s2 + $0x1] ss:$0 sm:$0xff] }
   0x4   :  { %v19_v10 = vld [vmem:[%s208_s1 + $0x8] sm:$0xff]  ;;  %v121_v24 = vld [vmem:[%s209_s2 + $0x2] ss:$0 sm:$0xff] }
   0x5   :  { %41 = vperm.xlu1 %124, %v24_v4   ;;  %31 = vperm.xlu0 %123, %v22_v8   ;;  %v23_v12 = vadd.f32 %v19_v10, %v15_v9 }
   0x9   :  { %46 = vperm.xlu1 %124, %v25_v11   ;;  %36 = vperm.xlu0 %123, %v23_v12  }
  0x84   :  { %v42_v14 = vpop.permute.xlu1 %41  ;;  %v32_v17 = vpop.permute.xlu0 %31 }
  0x85   :  { %v55_v16 = vmul.f32 %v119_v13, %v42_v14  ;;  %v53_v18 = vmul.f32 %v119_v13, %v32_v17 }
  0x87   :  { %v63_v19 = vadd.f32 %v120_v15, %v55_v16  ;;  %v61_v20 = vadd.f32 %v120_v15, %v53_v18 }
  0x88   :  { %v47_v21 = vpop.permute.xlu1 %46  ;;  %v37_v23 = vpop.permute.xlu0 %36 }
  0x89   :  { %v56_v22 = vmul.f32 %v119_v13, %v47_v21  ;;  %v67_v25 = vmax.f32 %v63_v19, 0.0  ;;  %v65_v26 = vmax.f32 %v61_v20, 0.0  ;;  %v54_v27 = vmul.f32 %v119_v13, %v37_v23 }
  0x8b   :  { %v64_v28 = vadd.f32 %v120_v15, %v56_v22  ;;  %v62_v29 = vadd.f32 %v120_v15, %v54_v27  ;;  %v73_v30 = vmul.f32 %v121_v24, %v65_v26  ;;  %v75_v32 = vmul.f32 %v121_v24, %v67_v25 }
  0x8d   :  { %v66_v31 = vmax.f32 %v62_v29, 0.0  ;;  %77 = vadd.xlane.f32.xlu0 %v73_v30  ;;  %v68_v33 = vmax.f32 %v64_v28, 0.0 }
  0x8f   :  { %v74_v34 = vmul.f32 %v121_v24, %v66_v31  ;;  %v76_v35 = vmul.f32 %v121_v24, %v68_v33 }
  0x91   :  { %81 = vadd.xlane.f32.xlu0 %v75_v32  ;;  %79 = vadd.xlane.f32.xlu1 %v74_v34 }
  0x95   :  { %83 = vadd.xlane.f32.xlu0 %v76_v35 }
 0x11a   :  { %v78_v36 = vpop.xlane.xlu0 %77 }
 0x11b   :  { %v85_v37 = vmul.f32 0.5, %v78_v36 }
 0x11d   :  { %125 = vtanh.f32 %v85_v37 }
 0x11e   :  { %v80_v38 = vpop.xlane.xlu1 %79  ;;  %v82_v39 = vpop.xlane.xlu0 %81 }
 0x11f   :  { %v86_v40 = vmul.f32 0.5, %v80_v38  ;;  %v87_v41 = vmul.f32 0.5, %v82_v39 }
 0x121   :  { %127 = vtanh.f32 %v86_v40 }
 0x122   :  { %129 = vtanh.f32 %v87_v41  ;;  %v84_v42 = vpop.xlane.xlu0 %83 }
 0x123   :  { %v88_v43 = vmul.f32 0.5, %v84_v42 }
 0x125   :  { %131 = vtanh.f32 %v88_v43 }
 0x127   :  { %v126_v44 = vpop.eup %125 }
 0x128   :  { %v93_v45 = vadd.f32 1.0, %v126_v44 }
 0x12a   :  { %v97_v46 = vmul.f32 0.5, %v93_v45 }
 0x12b   :  { %v128_v47 = vpop.eup %127 }
 0x12c   :  { %v130_v48 = vpop.eup %129  ;;  %v101_v49 = vsub.f32 1.0, %v97_v46  ;;  %v94_v50 = vadd.f32 1.0, %v128_v47 }
 0x12d   :  { %v95_v51 = vadd.f32 1.0, %v130_v48 }
 0x12e   :  { %v106_v52 = vsel %vm105_vm0, %v101_v49, %v97_v46  ;;  %v98_v53 = vmul.f32 0.5, %v94_v50 }
 0x12f   :  { %v132_v54 = vpop.eup %131  ;;  %111 = vst.msk [vmem:[%s210_s3] sm:$0xff] %vm110_vm1, %v106_v52  ;;  %v99_v55 = vmul.f32 0.5, %v95_v51 }
 0x130   :  { %v102_v56 = vsub.f32 1.0, %v98_v53  ;;  %v96_v57 = vadd.f32 1.0, %v132_v54 }
 0x131   :  { %v103_v58 = vsub.f32 1.0, %v99_v55 }
 0x132   :  { %v107_v59 = vsel %vm105_vm0, %v102_v56, %v98_v53  ;;  %v100_v60 = vmul.f32 0.5, %v96_v57 }
 0x133   :  { %112 = vst.msk [vmem:[%s210_s3 + $0x8] sm:$0xff] %vm110_vm1, %v107_v59  ;;  %v108_v61 = vsel %vm105_vm0, %v103_v58, %v99_v55 }
 0x134   :  { %113 = vst.msk [vmem:[%s210_s3 + $0x10] sm:$0xff] %vm110_vm1, %v108_v61  ;;  %v104_v62 = vsub.f32 1.0, %v100_v60 }
 0x136   :  { %v109_v63 = vsel %vm105_vm0, %v104_v62, %v100_v60 }
 0x137   :  { %114 = vst.msk [vmem:[%s210_s3 + $0x18] sm:$0xff] %vm110_vm1, %v109_v63 }

</bundles_post_ra>
